<compile_context>
chip_gen: v6e
topology: v6e:2x2x1
jax: 0.10.0
libtpu: 0.0.40
codegen_flags: <defaults>
</compile_context>

<pallas_src>
import math

import jax
import jax.numpy as jnp
from jax.experimental import pallas as pl
from jax.experimental.pallas import tpu as pltpu

LOG_2PI = math.log(2.0 * math.pi)


def _round_up(a, b):
    return (a + b - 1) // b * b


def _gmm_kernel(x_ref, wsq_ref, wlin_ref, const_ref, out_ref):
    """out[c, b] = sum_d Wsq[c,d]*x[b,d]^2 + Wlin[c,d]*x[b,d] + const[c]."""
    x = x_ref[...].astype(jnp.float32)                     # (tile_b, E)
    dn = (((1,), (1,)), ((), ()))                          # contract last dims
    acc = jax.lax.dot_general(wsq_ref[...], x * x, dn,
                              preferred_element_type=jnp.float32)
    acc = acc + jax.lax.dot_general(wlin_ref[...], x, dn,
                                    preferred_element_type=jnp.float32)
    out_ref[...] = (acc + const_ref[...]).astype(out_ref.dtype)


def class_conditional_gmm(x, embed_weight, n_classes, embed_size, *,
                          tile_b=512, log_softmax=False):
    """x: (B, E); embed_weight: (C, 2E) -> (B, C) log-likelihoods."""
    B, E = x.shape
    C = n_classes
    assert E == embed_size
    assert embed_weight.shape == (C, 2 * E)

    xf = x.astype(jnp.float32)
    mean = embed_weight[:, :E].astype(jnp.float32)         # (C, E)
    log_sigma = embed_weight[:, E:].astype(jnp.float32)    # (C, E)

    # ---- weight-side preprocessing (hoisted; cache these for inference) ----
    inv_var = jnp.exp(-2.0 * log_sigma)                    # (C, E)
    wsq = -0.5 * inv_var                                   # multiplies x^2
    wlin = mean * inv_var                                  # multiplies x
    const = -0.5 * (E * LOG_2PI
                    + jnp.sum(2.0 * log_sigma + mean * mean * inv_var,
                              axis=-1))                    # (C,)

    C_pad = _round_up(C, 8)                                # sublane quantum
    if C_pad != C:
        wsq = jnp.pad(wsq, ((0, C_pad - C), (0, 0)))
        wlin = jnp.pad(wlin, ((0, C_pad - C), (0, 0)))
        const = jnp.pad(const, (0, C_pad - C))
    const2d = const.reshape(C_pad, 1)

    # ---- batch tiling --------------------------------------------------------
    if B <= max(int(tile_b), 128):
        # Single full-extent block: no padding, full-dim exemption.
        tile = B
        grid_b = 1
        B_pad = B
        x_pad = xf
    else:
        tile = max(128, _round_up(int(tile_b), 128))
        grid_b = -(-B // tile)
        # Rebalance so the padded tail stays small (avoids ~tile_b of waste).
        tile = max(128, _round_up(-(-B // grid_b), 128))
        grid_b = -(-B // tile)
        B_pad = grid_b * tile
        x_pad = xf if B_pad == B else jnp.pad(xf, ((0, B_pad - B), (0, 0)))

    out_t = pl.pallas_call(
        _gmm_kernel,
        out_shape=jax.ShapeDtypeStruct((C_pad, B_pad), jnp.float32),
        grid_spec=pltpu.PrefetchScalarGridSpec(
            num_scalar_prefetch=0,
            grid=(grid_b,),
            in_specs=[
                # batch-tiled x (double-buffered across the grid)
                pl.BlockSpec((tile, E), lambda i: (i, 0)),
                # tiny weight / const blocks stay resident every step
                pl.BlockSpec((C_pad, E), lambda i: (0, 0)),
                pl.BlockSpec((C_pad, E), lambda i: (0, 0)),
                pl.BlockSpec((C_pad, 1), lambda i: (0, 0)),
            ],
            out_specs=pl.BlockSpec((C_pad, tile), lambda i: (0, i)),
        ),
        compiler_params=pltpu.CompilerParams(
            dimension_semantics=("parallel",)),
        # For very large E/C configs on v5e/v7x, add
        # vmem_limit_bytes=... and pipeline_mode=pl.Buffered(1) on the
        # resident weight specs; unnecessary at SDIM scales.
    )(x_pad, wsq, wlin, const2d)

    ll = out_t[:C, :B].T                                   # (B, C)
    if log_softmax:
        ll = jax.nn.log_softmax(ll, axis=-1)
    return ll


def _reference(x, embed_weight, n_classes, embed_size):
    """Plain-JAX transcription of the PyTorch forward for verification."""
    mean = embed_weight[:, :embed_size]                    # (C, E)
    log_sigma = embed_weight[:, embed_size:]               # (C, E)
    diff = x[:, None, :] - mean[None, :, :]                # (B, C, E)
    tmp = (LOG_2PI + 2.0 * log_sigma[None, :, :]
           + diff * diff * jnp.exp(-2.0 * log_sigma)[None, :, :])
    return (-0.5 * tmp).sum(axis=-1)                       # (B, C)


if __name__ == "__main__":
    # SDIM defaults: n_classes=10, rep_size (embed_size) = 64.
    n_classes = 10
    embed_size = 64

    key = jax.random.PRNGKey(0)
    kx1, kx2, kw = jax.random.split(key, 3)
    embed_weight = 0.5 * jax.random.normal(
        kw, (n_classes, 2 * embed_size), dtype=jnp.float32)

    # Case 1: small batch -> single full-extent block (grid = 1).
    x1 = jax.random.normal(kx1, (16, embed_size), dtype=jnp.float32)
    out1 = jax.block_until_ready(
        class_conditional_gmm(x1, embed_weight, n_classes, embed_size))
    ref1 = _reference(x1, embed_weight, n_classes, embed_size)
    assert out1.shape == (16, n_classes)
    assert jnp.allclose(out1, ref1, rtol=1e-3, atol=1e-3), "mismatch (case 1)"

    # Case 2: batch not a multiple of the tile -> grid of 3 with padded tail.
    x2 = jax.random.normal(kx2, (300, embed_size), dtype=jnp.float32)
    out2 = jax.block_until_ready(
        class_conditional_gmm(x2, embed_weight, n_classes, embed_size,
                              tile_b=128))
    ref2 = _reference(x2, embed_weight, n_classes, embed_size)
    assert out2.shape == (300, n_classes)
    assert jnp.allclose(out2, ref2, rtol=1e-3, atol=1e-3), "mismatch (case 2)"

    print("KERNEL_OK")
</pallas_src>

<mosaic_0001>
module attributes {stable_mosaic.version = 11 : i64} {
  func.func @_gmm_kernel(%arg0: i32, %arg1: memref<16x64xf32, #tpu.memory_space<vmem>>, %arg2: memref<16x64xf32, #tpu.memory_space<vmem>>, %arg3: memref<16x64xf32, #tpu.memory_space<vmem>>, %arg4: memref<16x1xf32, #tpu.memory_space<vmem>>, %arg5: memref<16x16xf32, #tpu.memory_space<vmem>>) attributes {dimension_semantics = [#tpu.dimension_semantics<parallel>], iteration_bounds = array<i64: 1>, scalar_prefetch = 0 : i64, scratch_operands = 0 : i64, tpu.core_type = #tpu.core_type<tc>, window_params = [{transform_indices = @transform_0, window_bounds = array<i64: 16, 64>}, {pipeline_mode = #tpu.pipeline_mode<synchronous>, transform_indices = @transform_1, window_bounds = array<i64: 16, 64>}, {pipeline_mode = #tpu.pipeline_mode<synchronous>, transform_indices = @transform_2, window_bounds = array<i64: 16, 64>}, {pipeline_mode = #tpu.pipeline_mode<synchronous>, transform_indices = @transform_3, window_bounds = array<i64: 16, 1>}, {transform_indices = @transform_4, window_bounds = array<i64: 16, 16>}]} {
    %c0 = arith.constant 0 : index
    %c0_0 = arith.constant 0 : index
    %0 = vector.load %arg1[%c0, %c0_0] : memref<16x64xf32, #tpu.memory_space<vmem>>, vector<16x64xf32>
    %c0_1 = arith.constant 0 : index
    %c0_2 = arith.constant 0 : index
    %1 = vector.load %arg2[%c0_1, %c0_2] : memref<16x64xf32, #tpu.memory_space<vmem>>, vector<16x64xf32>
    %2 = arith.mulf %0, %0 : vector<16x64xf32>
    %cst = arith.constant dense<0.000000e+00> : vector<16x16xf32>
    %3 = tpu.matmul %1, %2, %cst {dimension_numbers = #tpu.dot_dimension_numbers<[1], [1], [0], [0], [0, 0, 1, 0], [], []>} : vector<16x64xf32>, vector<16x64xf32>, vector<16x16xf32> -> vector<16x16xf32>
    %c0_3 = arith.constant 0 : index
    %c0_4 = arith.constant 0 : index
    %4 = vector.load %arg3[%c0_3, %c0_4] : memref<16x64xf32, #tpu.memory_space<vmem>>, vector<16x64xf32>
    %cst_5 = arith.constant dense<0.000000e+00> : vector<16x16xf32>
    %5 = tpu.matmul %4, %0, %cst_5 {dimension_numbers = #tpu.dot_dimension_numbers<[1], [1], [0], [0], [0, 0, 1, 0], [], []>} : vector<16x64xf32>, vector<16x64xf32>, vector<16x16xf32> -> vector<16x16xf32>
    %6 = arith.addf %3, %5 : vector<16x16xf32>
    %c0_6 = arith.constant 0 : index
    %c0_7 = arith.constant 0 : index
    %7 = vector.load %arg4[%c0_6, %c0_7] : memref<16x1xf32, #tpu.memory_space<vmem>>, vector<16x1xf32>
    %8 = vector.broadcast %7 : vector<16x1xf32> to vector<16x16xf32>
    %9 = arith.addf %6, %8 : vector<16x16xf32>
    %c0_8 = arith.constant 0 : index
    %c0_9 = arith.constant 0 : index
    %10 = vector.load %arg5[%c0_8, %c0_9] : memref<16x16xf32, #tpu.memory_space<vmem>>, vector<16x16xf32>
    tpu.vector_store %arg5[%c0_8, %c0_9], %9 {strides = array<i32>} : memref<16x16xf32, #tpu.memory_space<vmem>>, vector<16x16xf32>,
    return
  }
  func.func @transform_0(%arg0: i32) -> (i32, i32) {
    %c0_i32 = arith.constant 0 : i32
    %c0_i32_0 = arith.constant 0 : i32
    return %arg0, %c0_i32 : i32, i32
  }
  func.func @transform_1(%arg0: i32) -> (i32, i32) {
    %c0_i32 = arith.constant 0 : i32
    %c0_i32_0 = arith.constant 0 : i32
    %c0_i32_1 = arith.constant 0 : i32
    return %c0_i32, %c0_i32_0 : i32, i32
  }
  func.func @transform_2(%arg0: i32) -> (i32, i32) {
    %c0_i32 = arith.constant 0 : i32
    %c0_i32_0 = arith.constant 0 : i32
    %c0_i32_1 = arith.constant 0 : i32
    return %c0_i32, %c0_i32_0 : i32, i32
  }
  func.func @transform_3(%arg0: i32) -> (i32, i32) {
    %c0_i32 = arith.constant 0 : i32
    %c0_i32_0 = arith.constant 0 : i32
    %c0_i32_1 = arith.constant 0 : i32
    return %c0_i32, %c0_i32_0 : i32, i32
  }
  func.func @transform_4(%arg0: i32) -> (i32, i32) {
    %c0_i32 = arith.constant 0 : i32
    %c0_i32_0 = arith.constant 0 : i32
    return %c0_i32, %arg0 : i32, i32
  }
}

</mosaic_0001>

<bundles_post_ra>
// kernel: tpu_custom_call.1
= control target key start
LH: loop header
LB: loop body
LE: loop exit
PB: predicated region body
PF: predicated region fallthrough
CT: control target
= control target key end

     0   :  { %9 = vsyncpa [#allocation3], 0  ;;  %s440_s0 = inlined_call_operand.vmem [shape: f32[16,64], index: 0, kind: input, shape index: {}]   ;;  %s441_s1 = inlined_call_operand.hbm [shape: f32[16,64], index: 1, kind: input, shape index: {}]   ;;  %s442_s2 = inlined_call_operand.hbm [shape: f32[16,64], index: 2, kind: input, shape index: {}]   ;;  %s443_s3 = inlined_call_operand.vmem [shape: f32[16,1], index: 3, kind: input, shape index: {}]   ;;  %s444_s4 = inlined_call_operand.hbm [shape: f32[16,16], index: 4, kind: output, shape index: {}]  }
   0x1   :  { %10 = vsyncpa [#allocation6], 0 }
   0x2   :  { %11 = vsyncpa [#allocation4], 0  ;;  %s367_s15 = smov [#allocation2]  }
   0x3   :  { %s19_s16 = sshll.u32 %s367_s15, 4  ;;  %s20_s16 = int_to_ptr.vmem [resolvable:$true] %s19_s16 }
   0x4   :  { %s309_s17 = scalar_lea.vmem %s20_s16, 256  ;;  %p314_p1 = scmp.lt.s32.totalorder %s20_s16, %s20_s16 }
   0x5   :  { %p310_p0 = scmp.ne.s32.totalorder %s20_s16, %s309_s17  ;;  %p315_p2 = scmp.lt.s32.totalorder %s309_s17, %s309_s17 }
   0x7   :  { %p316_p3 = por %p315_p2, %p314_p1 }
   0x9   :  { %p317_p4 = pnand %p316_p3, %p310_p0 }
   0xb   :  { %320 = shalt.err (!%p317_p4)
}
   0xc   :  { %s368_s18 = smov 128   ;;  %s369_s19 = smov 8  }
   0xd   :  { %25 = dma.hbm_to_vmem [thread:$0]  %s441_s1, 256, %s20_s16, [#allocation3], %s368_s18, %s368_s18, %s369_s19  }
   0xe   :  { %s370_s22 = smov [#allocation5]  }
   0xf   :  { %s31_s23 = sshll.u32 %s370_s22, 4  ;;  %s32_s23 = int_to_ptr.vmem [resolvable:$true] %s31_s23 }
  0x10   :  { %s329_s24 = scalar_lea.vmem %s32_s23, 256  ;;  %p334_p6 = scmp.lt.s32.totalorder %s32_s23, %s32_s23 }
  0x11   :  { %p330_p5 = scmp.ne.s32.totalorder %s32_s23, %s329_s24  ;;  %p335_p7 = scmp.lt.s32.totalorder %s329_s24, %s329_s24 }
  0x13   :  { %p336_p8 = por %p335_p7, %p334_p6 }
  0x15   :  { %p337_p9 = pnand %p336_p8, %p330_p5 }
  0x17   :  { %340 = shalt.err (!%p337_p9)
}
  0x18   :  { %37 = dma.hbm_to_vmem [thread:$0]  %s442_s2, 256, %s32_s23, [#allocation6], %s368_s18, %s368_s18, %s369_s19  }
  0x19   :  { %361 = dma.done.wait [#allocation3], 256  }
  0x1a   :  { %362 = vsyncadd [#allocation3], 4294967040 }
  0x1b   :  { %363 = dma.done.wait [#allocation6], 256  }
  0x1c   :  { %364 = vsyncadd [#allocation6], 4294967040  ;;  %v371_v0 = vmov 0   ;;  %vm54_vm0 = vcmask 523264   ;;  %v47_v1 = vld [vmem:[%s440_s0 + $0x8] sm:$0xff]  ;;  %v46_v2 = vld [vmem:[%s440_s0] sm:$0xff] }
  0x1d   :  { %300 = vset.pattern.permute.xlu0 %v371_v0  ;;  %v52_v3 = vld [vmem:[#allocation5] sm:$0xff]  ;;  %280 = vmatprep.subr.msk.mxu0 %vm54_vm0, %v47_v1  ;;  %v51_v4 = vmul.f32 %v47_v1, %v47_v1  ;;  %v50_v5 = vmul.f32 %v46_v2, %v46_v2  ;;  %v48_v6 = vld [vmem:[#allocation2] sm:$0xff]  ;;  %v230_v8 = vld [vmem:[%s443_s3 + $0x8] sm:$0xff]  ;;  %vm243_vm1 = vcmask 130048  }
  0x1e   :  { %284 = vmatprep.mubr.msk.f32.mxu0 %vm54_vm0, %v52_v3  ;;  %281 = vmatpush3.xpose.msk.msra.mxu0 %vm54_vm0, %v47_v1  ;;  %v229_v7 = vld [vmem:[%s443_s3] sm:$0xff]  ;;  %v53_v9 = vld [vmem:[#allocation5 + $0x8] sm:$0xff]  ;;  %v49_v10 = vld [vmem:[#allocation2 + $0x8] sm:$0xff]  ;;  %s372_s3 = smov [#allocation7]  }
  0x1f   :  { %291 = vmatprep.mubr.msk.f32.mxu1 %vm54_vm0, %v48_v6  ;;  %287 = vmatprep.subr.msk.mxu1 %vm54_vm0, %v51_v4  ;;  %s251_s6 = sshll.u32 %s372_s3, 4  ;;  %s252_s6 = int_to_ptr.vmem [resolvable:$true] %s251_s6 }
  0x20   :  { %282 = vmatprep.subr.msk.mxu0 %vm54_vm0, %v46_v2  ;;  %288 = vmatpush3.xpose.msk.msra.mxu1 %vm54_vm0, %v51_v4  ;;  %s341_s7 = scalar_lea.vmem %s252_s6, 256  ;;  %p346_p11 = scmp.lt.s32.totalorder %s252_s6, %s252_s6 }
  0x21   :  { %233 = vperm.xlu0 %300, %v229_v7   ;;  %289 = vmatprep.subr.msk.mxu1 %vm54_vm0, %v50_v5  ;;  %p342_p10 = scmp.ne.s32.totalorder %s252_s6, %s341_s7  ;;  %p347_p12 = scmp.lt.s32.totalorder %s341_s7, %s341_s7 }
  0x22   :  { %283 = vmatpush3.xpose.msk.msra.mxu0 %vm54_vm0, %v46_v2 }
  0x23   :  { %p348_p13 = por %p347_p12, %p346_p11 }
  0x24   :  { %290 = vmatpush3.xpose.msk.msra.mxu1 %vm54_vm0, %v50_v5 }
  0x25   :  { %238 = vperm.xlu0 %300, %v230_v8   ;;  %285 = vmatmul.mubr.msk.f32.vlgmr.msra.gmra.mxu0 %vm54_vm0, %v53_v9  ;;  %p349_p0 = pnand %p348_p13, %p342_p10 }
  0x27   :  { %292 = vmatmul.mubr.msk.f32.vlgmr.msra.gmra.mxu1 %vm54_vm0, %v49_v10 }
  0x9c   :  { %v234_v11 = vpop.permute.xlu0 %233 }
  0xa0   :  { %v239_v14 = vpop.permute.xlu0 %238 }
  0xe5   :  { %v286_v12 = vpop.f32.mrf.mxu0 }
  0xe7   :  { %v293_v13 = vpop.f32.mrf.mxu1  ;;  %v133_v16 = vpop.f32.mrf.mxu0 }
  0xe8   :  { %v226_v15 = vadd.f32 %v293_v13, %v286_v12 }
  0xe9   :  { %v220_v17 = vpop.f32.mrf.mxu1 }
  0xea   :  { %v242_v18 = vadd.f32 %v239_v14, %v226_v15  ;;  %v221_v19 = vadd.f32 %v220_v17, %v133_v16 }
  0xec   :  { %v241_v20 = vadd.f32 %v234_v11, %v221_v19  ;;  %245 = vst.msk [vmem:[#allocation7 + $0x8] sm:$0xff] %vm243_vm1, %v242_v18 }
  0xee   :  { %244 = vst.msk [vmem:[#allocation7] sm:$0xff] %vm243_vm1, %v241_v20 }
  0xef   :  { %352 = shalt.err (!%p349_p0)
}
  0xf0   :  { %257 = dma.vmem_to_hbm [thread:$0]  %s252_s6, 256, %s444_s4, [#allocation4], %s368_s18, %s368_s18, %s369_s19  }
  0xf1   :  { %365 = dma.done.wait [#allocation4], 256  }
  0xf2   :  { %366 = vsyncadd [#allocation4], 4294967040 }
  0xf3   :  { %261 = vsyncpa [#allocation3], 1 }
  0xf4   :  { %262 = vsyncpa [#allocation6], 1 }
  0xf5   :  { %263 = vsyncpa [#allocation4], 1 }

</bundles_post_ra>
